<compile_context>
chip_gen: v7x
topology: tpu7x:2x2x1
jax: 0.10.0
libtpu: 0.0.40
codegen_flags: <defaults>
</compile_context>

<pallas_src>
import math

import jax
import jax.numpy as jnp
from jax.experimental import pallas as pl
from jax.experimental.pallas import tpu as pltpu


# ----------------------------------------------------------------------------
# Buffer setup (matches nn.Module.__init__).  Per-call preprocessing hoisted:
# buffer is stored flattened and already in the activation dtype.
# ----------------------------------------------------------------------------
def make_positional_encoding(d_model: int, max_len: int = 500,
                             dtype=jnp.float32) -> jnp.ndarray:
    """Returns the sinusoidal PE buffer, flattened to (1, max_len*d_model)."""
    position = jnp.arange(0, max_len, dtype=jnp.float32)[:, None]            # (L, 1)
    div_term = jnp.exp(
        jnp.arange(0, d_model, 2, dtype=jnp.float32) * (-math.log(10000.0) / d_model)
    )                                                                         # (ceil(D/2),)
    angles = position * div_term                                              # (L, ceil(D/2))
    pe = jnp.zeros((max_len, d_model), dtype=jnp.float32)
    pe = pe.at[:, 0::2].set(jnp.sin(angles))
    pe = pe.at[:, 1::2].set(jnp.cos(angles)[:, : d_model // 2])               # odd-D guard
    return pe.astype(dtype).reshape(1, max_len * d_model)


# ----------------------------------------------------------------------------
# Kernels: broadcast adds (HBM-bandwidth bound)
# ----------------------------------------------------------------------------
def _add_pe_flat_kernel(x_ref, pe_ref, o_ref):
    # x/o: (tb, tl) tile of flattened (B, S*D); pe: (1, tl) sublane broadcast
    o_ref[...] = x_ref[...] + pe_ref[...]


def _add_pe_3d_kernel(x_ref, pe_ref, o_ref):
    # x/o: (tb, tS, D); pe: (1, tS, D) broadcast over batch
    o_ref[...] = x_ref[...] + pe_ref[...]


# ----------------------------------------------------------------------------
# Generation-gated budgets & tile selection
# ----------------------------------------------------------------------------
def _vmem_budgets():
    """(tile_bytes, vmem_limit_bytes), gated on physical VMEM size."""
    try:
        info = pltpu.get_tpu_info()
        vmem_phys = int(getattr(info, "vmem_capacity_bytes", 64 * 1024 * 1024))
    except Exception:
        vmem_phys = 64 * 1024 * 1024                 # conservative (v7x per-TC)
    if vmem_phys >= 100 * 1024 * 1024:               # v5e / v6e: 128 MiB physical
        return 8 * 1024 * 1024, 64 * 1024 * 1024
    return 4 * 1024 * 1024, 32 * 1024 * 1024         # v7x: 64 MiB per TC


def _sublane_align(itemsize: int) -> int:
    # 8 for f32, 16 for bf16/f16, 32 for int8/fp8 (full packed vreg row group)
    return max(8, 32 // max(1, itemsize))


def _choose_flat_tiles(B: int, L: int, itemsize: int, tile_bytes: int):
    """Tiles for the flattened (B, S*D) path.  Requires L % 128 == 0."""
    sub = _sublane_align(itemsize)
    # Lane-dense (multiple of 128), but biased "taller" within the byte budget.
    lane_budget = max(128, ((tile_bytes // (sub * itemsize)) // 128) * 128)
    tl = min(L, 16384, lane_budget)
    rows = max(sub, tile_bytes // (tl * itemsize))
    tb = B if B <= rows else max(sub, (rows // sub) * sub)
    return tb, tl


def _choose_3d_tiles(B: int, S: int, D: int, itemsize: int, tile_bytes: int):
    """Tiles for the bounded (tb, tS, D) fallback (S*D not 128-aligned)."""
    sub = _sublane_align(itemsize)
    row_bytes = D * itemsize
    row_budget = max(1, tile_bytes // row_bytes)
    if S <= row_budget:
        tS = S                                        # full dim -> always legal
    else:
        # multiple of 8 (legal block dim) and dtype-aligned when possible
        tS = min(S, max(8, (row_budget // sub) * sub))
    tb = max(1, min(B, tile_bytes // max(1, tS * row_bytes)))
    return tb, tS


# ----------------------------------------------------------------------------
# Forward
# ----------------------------------------------------------------------------
def _forward_flat(x, pe_flat, tile_bytes, vmem_limit, donate_x):
    B, S, D = x.shape
    L = S * D
    x_flat = x.reshape(B, L)                          # free, row-major compatible
    tb, tl = _choose_flat_tiles(B, L, x.dtype.itemsize, tile_bytes)

    out_flat = pl.pallas_call(
        _add_pe_flat_kernel,
        out_shape=jax.ShapeDtypeStruct((B, L), x.dtype),
        grid_spec=pltpu.PrefetchScalarGridSpec(
            num_scalar_prefetch=0,
            # Batch is the innermost (fastest-varying) grid axis: pe's block
            # index (0, j) is constant across consecutive steps -> no re-DMA.
            grid=(pl.cdiv(L, tl), pl.cdiv(B, tb)),
            in_specs=[
                pl.BlockSpec((tb, tl), lambda j, i: (i, j)),   # x tile
                pl.BlockSpec((1, tl), lambda j, i: (0, j)),    # shared pe tile
            ],
            out_specs=pl.BlockSpec((tb, tl), lambda j, i: (i, j)),
        ),
        compiler_params=pltpu.CompilerParams(
            dimension_semantics=("parallel", "parallel"),
            vmem_limit_bytes=vmem_limit,
        ),
        input_output_aliases=({0: 0} if donate_x else {}),
    )(x_flat, pe_flat)
    return out_flat.reshape(B, S, D)


def _forward_3d(x, pe_flat, tile_bytes, vmem_limit, donate_x):
    B, S, D = x.shape
    max_len = pe_flat.shape[1] // D
    # Fallback only: slice pe so every block dim is either a multiple of 8/128
    # or the full array dim; VMEM stays bounded via (tb, tS) instead of tl=L.
    pe_3d = pe_flat.reshape(1, max_len, D)[:, :S, :]
    tb, tS = _choose_3d_tiles(B, S, D, x.dtype.itemsize, tile_bytes)

    return pl.pallas_call(
        _add_pe_3d_kernel,
        out_shape=jax.ShapeDtypeStruct((B, S, D), x.dtype),
        grid_spec=pltpu.PrefetchScalarGridSpec(
            num_scalar_prefetch=0,
            grid=(pl.cdiv(S, tS), pl.cdiv(B, tb)),     # batch innermost
            in_specs=[
                pl.BlockSpec((tb, tS, D), lambda s, b: (b, s, 0)),   # x tile
                pl.BlockSpec((1, tS, D), lambda s, b: (0, s, 0)),    # pe tile
            ],
            out_specs=pl.BlockSpec((tb, tS, D), lambda s, b: (b, s, 0)),
        ),
        compiler_params=pltpu.CompilerParams(
            dimension_semantics=("parallel", "parallel"),
            vmem_limit_bytes=vmem_limit,
        ),
        input_output_aliases=({0: 0} if donate_x else {}),
    )(x, pe_3d)


def positional_encoding_forward(x: jnp.ndarray, pe_flat: jnp.ndarray,
                                donate_x: bool = False) -> jnp.ndarray:
    """x: (B, S, D); pe_flat: (1, max_len*D) from make_positional_encoding."""
    B, S, D = x.shape
    assert pe_flat.shape[1] % D == 0 and S <= pe_flat.shape[1] // D, \
        "sequence length exceeds PE buffer"
    tile_bytes, vmem_limit = _vmem_budgets()
    if (S * D) % 128 == 0:
        return _forward_flat(x, pe_flat, tile_bytes, vmem_limit, donate_x)
    return _forward_3d(x, pe_flat, tile_bytes, vmem_limit, donate_x)


# ----------------------------------------------------------------------------
# Reference (pure JAX) for sanity check
# ----------------------------------------------------------------------------
def positional_encoding_ref(x: jnp.ndarray, pe_flat: jnp.ndarray) -> jnp.ndarray:
    B, S, D = x.shape
    pe = pe_flat.reshape(pe_flat.shape[1] // D, D)
    return x + pe[None, :S, :]


if __name__ == "__main__":
    MAX_LEN = 500
    key = jax.random.PRNGKey(0)

    # Primary shapes consistent with the module: batch=2, seq=8, d_model=32
    # (S*D = 256 -> lane-dense flattened path).
    B, S, D = 2, 8, 32
    k0, k1 = jax.random.split(key)
    x = jax.random.normal(k0, (B, S, D), dtype=jnp.float32)
    pe_flat = make_positional_encoding(D, MAX_LEN, dtype=x.dtype)

    out = jax.block_until_ready(positional_encoding_forward(x, pe_flat))
    ref = positional_encoding_ref(x, pe_flat)
    assert out.shape == (B, S, D)
    assert jnp.allclose(out, ref, atol=1e-6, rtol=1e-6), "flat-path mismatch"

    # Exercise the bounded non-128-aligned fallback (S*D = 168).
    B2, S2, D2 = 2, 7, 24
    x2 = jax.random.normal(k1, (B2, S2, D2), dtype=jnp.float32)
    pe_flat2 = make_positional_encoding(D2, MAX_LEN, dtype=x2.dtype)
    out2 = jax.block_until_ready(positional_encoding_forward(x2, pe_flat2))
    ref2 = positional_encoding_ref(x2, pe_flat2)
    assert out2.shape == (B2, S2, D2)
    assert jnp.allclose(out2, ref2, atol=1e-6, rtol=1e-6), "3d-path mismatch"

    print("KERNEL_OK")
</pallas_src>

<mosaic_0001>
module attributes {stable_mosaic.version = 11 : i64} {
  func.func @_add_pe_flat_kernel(%arg0: i32, %arg1: i32, %arg2: memref<2x256xf32, #tpu.memory_space<vmem>>, %arg3: memref<1x256xf32, #tpu.memory_space<vmem>>, %arg4: memref<2x256xf32, #tpu.memory_space<vmem>>) attributes {dimension_semantics = [#tpu.dimension_semantics<parallel>, #tpu.dimension_semantics<parallel>], iteration_bounds = array<i64: 1, 1>, scalar_prefetch = 0 : i64, scratch_operands = 0 : i64, tpu.core_type = #tpu.core_type<tc>, window_params = [{transform_indices = @transform_0, window_bounds = array<i64: 2, 256>}, {transform_indices = @transform_1, window_bounds = array<i64: 1, 256>}, {transform_indices = @transform_2, window_bounds = array<i64: 2, 256>}]} {
    %c0 = arith.constant 0 : index
    %c0_0 = arith.constant 0 : index
    %0 = vector.load %arg2[%c0, %c0_0] : memref<2x256xf32, #tpu.memory_space<vmem>>, vector<2x256xf32>
    %c0_1 = arith.constant 0 : index
    %c0_2 = arith.constant 0 : index
    %1 = vector.load %arg3[%c0_1, %c0_2] : memref<1x256xf32, #tpu.memory_space<vmem>>, vector<1x256xf32>
    %2 = vector.broadcast %1 : vector<1x256xf32> to vector<2x256xf32>
    %3 = arith.addf %0, %2 : vector<2x256xf32>
    %c0_3 = arith.constant 0 : index
    %c0_4 = arith.constant 0 : index
    %4 = vector.load %arg4[%c0_3, %c0_4] : memref<2x256xf32, #tpu.memory_space<vmem>>, vector<2x256xf32>
    tpu.vector_store %arg4[%c0_3, %c0_4], %3 {strides = array<i32>} : memref<2x256xf32, #tpu.memory_space<vmem>>, vector<2x256xf32>,
    return
  }
  func.func @transform_0(%arg0: i32, %arg1: i32) -> (i32, i32) {
    %c0_i32 = arith.constant 0 : i32
    return %arg1, %arg0 : i32, i32
  }
  func.func @transform_1(%arg0: i32, %arg1: i32) -> (i32, i32) {
    %c0_i32 = arith.constant 0 : i32
    %c0_i32_0 = arith.constant 0 : i32
    return %c0_i32, %arg0 : i32, i32
  }
  func.func @transform_2(%arg0: i32, %arg1: i32) -> (i32, i32) {
    %c0_i32 = arith.constant 0 : i32
    return %arg1, %arg0 : i32, i32
  }
}

</mosaic_0001>

<bundles_post_ra>
// kernel: tpu_custom_call.1
= control target key start
LH: loop header
LB: loop body
LE: loop exit
PB: predicated region body
PF: predicated region fallthrough
CT: control target
= control target key end

     0   :  { %7 = vsyncpa [#allocation3], 0  ;;  %s215_s0 = inlined_call_operand.hbm [shape: f32[2,256], index: 0, kind: input, shape index: {}]   ;;  %s216_s1 = inlined_call_operand.hbm [shape: f32[1,16000], index: 1, kind: input, shape index: {}]   ;;  %s217_s2 = inlined_call_operand.hbm [shape: f32[2,256], index: 2, kind: output, shape index: {}]  }
   0x1   :  { %8 = vsyncpa [#allocation6], 0 }
   0x2   :  { %9 = vsyncpa [#allocation4], 0  ;;  %s150_s9 = smov [#allocation2]   ;;  %s151_s11 = smov [#allocation5]  }
   0x3   :  { %s16_s10 = sshll.u32 %s150_s9, 4  ;;  %s26_s12 = sshll.u32 %s151_s11, 4  ;;  %s17_s10 = int_to_ptr.vmem [resolvable:$true] %s16_s10  ;;  %s169_s12 = int_to_ptr.vmem [resolvable:$true] %s26_s12 }
   0x4   :  { %s78_s15 = scalar_lea.hbm %s215_s0, 64 }
   0x5   :  { %p79_p0 = scmp.ne.s32.totalorder %s215_s0, %s78_s15  ;;  %p82_p1 = scmp.lt.u32.totalorder %s78_s15, %s215_s0 }
   0x7   :  { %p84_p2 = pnand %p82_p1, %p79_p0 }
   0x9   :  { %87 = shalt.err (!%p84_p2)
}
   0xa   :  { %s88_s20 = scalar_lea.vmem %s17_s10, 64  ;;  %p93_p4 = scmp.lt.s32.totalorder %s17_s10, %s17_s10 }
   0xb   :  { %p89_p3 = scmp.ne.s32.totalorder %s17_s10, %s88_s20  ;;  %p94_p5 = scmp.lt.s32.totalorder %s88_s20, %s88_s20 }
   0xd   :  { %p95_p6 = por %p94_p5, %p93_p4 }
   0xf   :  { %p96_p7 = pnand %p95_p6, %p89_p3 }
  0x11   :  { %99 = shalt.err (!%p96_p7)
}
  0x12   :  { %19 = dma.hbm_to_vmem [thread:$0]  %s215_s0, 64, %s17_s10, [#allocation3]  }
  0x13   :  { %s100_s25 = scalar_lea.hbm %s216_s1, 32  ;;  %s102_s30 = scalar_lea.hbm %s216_s1, 2000 }
  0x14   :  { %p101_p8 = scmp.ne.s32.totalorder %s216_s1, %s100_s25  ;;  %p103_p9 = scmp.lt.u32.totalorder %s102_s30, %s100_s25 }
  0x15   :  { %p104_p10 = scmp.lt.u32.totalorder %s100_s25, %s216_s1 }
  0x17   :  { %p105_p11 = por %p104_p10, %p103_p9 }
  0x19   :  { %p106_p12 = pnand %p105_p11, %p101_p8 }
  0x1b   :  { %109 = shalt.err (!%p106_p12)
}
  0x1c   :  { %s110_s0 = scalar_lea.vmem %s169_s12, 32  ;;  %p115_p0 = scmp.lt.s32.totalorder %s169_s12, %s169_s12 }
  0x1d   :  { %p111_p13 = scmp.ne.s32.totalorder %s169_s12, %s110_s0  ;;  %p116_p1 = scmp.lt.s32.totalorder %s110_s0, %s110_s0 }
  0x1f   :  { %p117_p2 = por %p116_p1, %p115_p0 }
  0x21   :  { %p118_p3 = pnand %p117_p2, %p111_p13 }
  0x23   :  { %121 = shalt.err (!%p118_p3)
}
  0x24   :  { %29 = dma.hbm_to_vmem [thread:$0]  %s216_s1, 32, %s169_s12, [#allocation6]  }
  0x25   :  { %144 = dma.done.wait [#allocation3], 64  }
  0x26   :  { %145 = vsyncadd [#allocation3], 4294967232 }
  0x27   :  { %146 = dma.done.wait [#allocation6], 32  }
  0x28   :  { %147 = vsyncadd [#allocation6], 4294967264  ;;  %v39_v0 = vlaneseq  ;;  %v152_v1 = vmov 1983009808   ;;  %v37_v7 = vld [vmem:[#allocation5] sm:$0x3] }
  0x29   :  { %v49_v2 = vunpack.c.l.s4 %v152_v1  ;;  %v36_v12 = vld [vmem:[#allocation2] sm:$0xf]  ;;  %s153_s7 = smov [#allocation7]  }
  0x2a   :  { %v40_v3 = vshrl.u32 %v39_v0, 7  ;;  %s64_s8 = sshll.u32 %s153_s7, 4  ;;  %s65_s8 = int_to_ptr.vmem [resolvable:$true] %s64_s8 }
  0x2b   :  { %v50_v6 = vunpack.c.0.s8 %v49_v2  ;;  %s122_s1 = scalar_lea.vmem %s65_s8, 64  ;;  %p127_p5 = scmp.lt.s32.totalorder %s65_s8, %s65_s8 }
  0x2c   :  { %v41_v4 = vsub.s32 0, %v40_v3  ;;  %v45_v5 = vsub.s32 1, %v40_v3  ;;  %p123_p4 = scmp.ne.s32.totalorder %s65_s8, %s122_s1  ;;  %p128_p6 = scmp.lt.s32.totalorder %s122_s1, %s122_s1 }
  0x2d   :  { %v53_v10 = vsub.s32 %v50_v6, %v40_v3 }
  0x2e   :  { %v42_v8 = vrot.slane %v37_v7, %v41_v4  ;;  %v46_v9 = vrot.slane %v37_v7, %v45_v5  ;;  %p129_p7 = por %p128_p6, %p127_p5 }
  0x30   :  { %v47_v11 = vcombine.low %v42_v8, %v46_v9  ;;  %p130_p8 = pnand %p129_p7, %p123_p4 }
  0x32   :  { %v54_v13 = vrot.slane %v47_v11, %v53_v10 }
  0x34   :  { %v56_v14 = vadd.f32 %v54_v13, %v36_v12 }
  0x36   :  { %57 = vst [vmem:[#allocation7] sm:$0xf] %v56_v14 }
  0x37   :  { %133 = shalt.err (!%p130_p8)
}
  0x38   :  { %s134_s11 = scalar_lea.hbm %s217_s2, 64 }
  0x39   :  { %p135_p9 = scmp.ne.s32.totalorder %s217_s2, %s134_s11  ;;  %p138_p10 = scmp.lt.u32.totalorder %s134_s11, %s217_s2 }
  0x3b   :  { %p140_p11 = pnand %p138_p10, %p135_p9 }
  0x3d   :  { %143 = shalt.err (!%p140_p11)
}
  0x3e   :  { %67 = dma.vmem_to_hbm [thread:$0]  %s65_s8, 64, %s217_s2, [#allocation4]  }
  0x3f   :  { %148 = dma.done.wait [#allocation4], 64  }
  0x40   :  { %149 = vsyncadd [#allocation4], 4294967232 }
  0x41   :  { %71 = vsyncpa [#allocation3], 1 }
  0x42   :  { %72 = vsyncpa [#allocation6], 1 }
  0x43   :  { %73 = vsyncpa [#allocation4], 1 }

</bundles_post_ra>
